<compile_context>
chip_gen: v7x
topology: tpu7x:2x2x1
jax: 0.10.0
libtpu: 0.0.40
codegen_flags: <defaults>
</compile_context>

<pallas_src>
from functools import partial

import numpy as np

import jax
import jax.numpy as jnp
from jax.experimental import pallas as pl
from jax.experimental.pallas import tpu as pltpu


def _zero_plane_kernel(drop_ref, x_hbm_ref, o_ref):
    # drop_ref : SMEM int32[num_drop]  (consumed only by the output index_map)
    # x_hbm_ref: raw HBM ref of the (aliased, donated) input -- never read
    # o_ref    : VMEM (T, 1, R, S1) block of the dropped plane for this step
    del drop_ref, x_hbm_ref
    o_ref[...] = jnp.zeros(o_ref.shape, dtype=o_ref.dtype)


def _row_chunk(s0, per_row_bytes, itemsize):
    """Largest row chunk R of the (s0, s1) plane keeping one output block
    (T, 1, R, s1) under ~2 MiB, preferring R that divides s0 and is a multiple
    of the dtype sublane pack."""
    pack = {4: 8, 2: 16, 1: 32}.get(int(itemsize), 8)
    target = 2 << 20  # ~2 MiB per block; double-buffered -> ~4 MiB VMEM
    if s0 * per_row_bytes <= target:
        return s0
    max_rows = max(pack, (target // per_row_bytes) // pack * pack)
    r = max_rows
    while r >= pack:
        if s0 % r == 0:
            return r
        r -= pack
    # No clean divisor: use a pack-multiple chunk; Pallas clips the tail block.
    return min(max_rows, s0)


@partial(jax.jit, donate_argnums=(0,))
def _channel_dropout_jit(x, drop_table):
    """x: [T, C, H, W] (donated); drop_table: int32[num_drop], unique channel
    ids in [0, C).  Returns x with those channels zeroed, reusing x's buffer."""
    T, C, H, W = x.shape
    HW = H * W
    itemsize = jnp.dtype(x.dtype).itemsize

    if HW % 128 == 0:
        s0, s1 = HW // 128, 128          # lane-dense: unmasked 128-wide stores
    else:
        s0, s1 = 1, HW                   # one flat contiguous slab per (t, c)
        # TODO(synk): very large planes with H*W not a multiple of 128 are not
        # sub-tiled (single (1, H*W) block); fine for typical crop-sized inputs.

    r_rows = _row_chunk(s0, T * s1 * itemsize, itemsize)
    n_chunks = (s0 + r_rows - 1) // r_rows
    num_drop = drop_table.shape[0]

    x_r = x.reshape(T, C, s0, s1)        # row-major reshape -> bitcast, keeps alias

    def out_index_map(r, d, drop_ref):
        return (0, drop_ref[d], r, 0)

    out = pl.pallas_call(
        _zero_plane_kernel,
        out_shape=jax.ShapeDtypeStruct(x_r.shape, x_r.dtype),
        grid_spec=pltpu.PrefetchScalarGridSpec(
            num_scalar_prefetch=1,
            grid=(n_chunks, num_drop),
            in_specs=[pl.BlockSpec(memory_space=pl.ANY)],   # x stays in HBM, never DMA'd
            out_specs=pl.BlockSpec((T, 1, r_rows, s1), out_index_map),
        ),
        # Flat input index 1 (after the scalar-prefetch table) is x_r; alias it
        # to output 0 so untouched channels keep their data with zero traffic.
        input_output_aliases={1: 0},
        compiler_params=pltpu.CompilerParams(
            dimension_semantics=("parallel", "parallel"),
        ),
    )(drop_table, x_r)
    return out.reshape(T, C, H, W)


def channel_dropout_pallas(x, drop_indices):
    """Zero the listed channels of x ([T, C, H, W]).  NOTE: donates x's buffer
    (the caller's x becomes invalid); drop_indices must be host-resolvable."""
    table = np.unique(np.asarray(drop_indices, dtype=np.int32).reshape(-1))
    if table.size == 0:
        return x
    return _channel_dropout_jit(x, jnp.asarray(table, dtype=jnp.int32))


class RandomChannelDropout:
    """JAX/Pallas port of the PyTorch RandomChannelDropout module.

    Host-only contract: the drop decision / indices are resolved on the host
    (numpy RNG), mirroring torch.rand(1).item() / randint / randperm semantics.
    When channels are dropped, the input array's buffer is donated to the
    kernel (the passed-in `x` must not be reused by the caller afterwards).
    """

    def __init__(self, p=0.5, max_drop=1):
        self.p = p
        self.max_drop = max_drop

    def __call__(self, x, drop_indices=None, rng=None):
        # TODO(synk): a fully-traced in-jit stochastic branch (lax.cond on the
        # drop decision) has no clean equivalent when the no-drop branch must
        # skip the kernel entirely; host RNG matches the PyTorch semantics.
        C = x.shape[1]
        if drop_indices is None:
            rng = np.random.default_rng() if rng is None else rng
            if float(rng.random()) < self.p:
                num_drop = int(rng.integers(1, self.max_drop + 1))
                num_drop = min(num_drop, C)
                drop_indices = np.asarray(
                    rng.permutation(C)[:num_drop], dtype=np.int32
                )
        if drop_indices is not None:
            x = channel_dropout_pallas(x, drop_indices)
        return x, drop_indices


if __name__ == "__main__":
    key = jax.random.PRNGKey(0)
    T, C, H, W = 2, 4, 16, 16
    x = jax.random.normal(key, (T, C, H, W), dtype=jnp.float32)

    module = RandomChannelDropout(p=0.5, max_drop=1)

    # Path 1: explicit single drop index, lane-dense layout (H*W = 2*128).
    ref1 = x.at[:, 1, :, :].set(0.0)
    out1, idx1 = module(jnp.copy(x), drop_indices=np.array([1], dtype=np.int32))
    out1 = jax.block_until_ready(out1)
    assert out1.shape == x.shape and out1.dtype == x.dtype
    assert jnp.array_equal(out1, ref1), "mismatch vs reference (single drop)"

    # Path 2: multiple drops, true-length (deduped) drop table.
    module3 = RandomChannelDropout(p=1.0, max_drop=3)
    ref2 = x.at[:, jnp.array([0, 3]), :, :].set(0.0)
    out2, _ = module3(jnp.copy(x), drop_indices=np.array([0, 3], dtype=np.int32))
    out2 = jax.block_until_ready(out2)
    assert jnp.array_equal(out2, ref2), "mismatch vs reference (multi drop)"

    # Path 3: H*W not a multiple of 128 -> flat (1, H*W) contiguous fallback.
    x_small = jax.random.normal(jax.random.PRNGKey(1), (2, 4, 8, 12), jnp.float32)
    ref3 = x_small.at[:, 2, :, :].set(0.0)
    out3, _ = module(jnp.copy(x_small), drop_indices=np.array([2], dtype=np.int32))
    out3 = jax.block_until_ready(out3)
    assert jnp.array_equal(out3, ref3), "mismatch vs reference (fallback)"

    # Path 4: stochastic branch driven by host RNG (may or may not drop).
    rng = np.random.default_rng(0)
    out4, idx4 = module(jnp.copy(x), rng=rng)
    out4 = jax.block_until_ready(out4)
    if idx4 is None:
        assert jnp.array_equal(out4, x)
    else:
        ref4 = x.at[:, jnp.asarray(np.asarray(idx4)), :, :].set(0.0)
        assert jnp.array_equal(out4, ref4), "mismatch vs reference (stochastic)"

    print("KERNEL_OK")
</pallas_src>

<mosaic_0001>
module attributes {stable_mosaic.version = 11 : i64} {
  func.func @_zero_plane_kernel(%arg0: i32, %arg1: i32, %arg2: memref<1xi32, #tpu.memory_space<smem>>, %arg3: memref<2x4x2x128xf32, #tpu.memory_space<any>>, %arg4: memref<2x1x2x128xf32, #tpu.memory_space<vmem>>) attributes {dimension_semantics = [#tpu.dimension_semantics<parallel>, #tpu.dimension_semantics<parallel>], iteration_bounds = array<i64: 1, 1>, scalar_prefetch = 1 : i64, scratch_operands = 0 : i64, tpu.core_type = #tpu.core_type<tc>, window_params = [{}, {transform_indices = @transform_1, window_bounds = array<i64: 2, 1, 2, 128>}]} {
    %cst = arith.constant 0.000000e+00 : f32
    %0 = vector.broadcast %cst : f32 to vector<2x1x2x128xf32>
    %c0 = arith.constant 0 : index
    %c0_0 = arith.constant 0 : index
    %c0_1 = arith.constant 0 : index
    %c0_2 = arith.constant 0 : index
    %1 = vector.load %arg4[%c0, %c0_0, %c0_1, %c0_2] : memref<2x1x2x128xf32, #tpu.memory_space<vmem>>, vector<2x1x2x128xf32>
    tpu.vector_store %arg4[%c0, %c0_0, %c0_1, %c0_2], %0 {strides = array<i32>} : memref<2x1x2x128xf32, #tpu.memory_space<vmem>>, vector<2x1x2x128xf32>,
    return
  }
  func.func @transform_1(%arg0: i32, %arg1: i32, %arg2: memref<1xi32, #tpu.memory_space<smem>>) -> (i32, i32, i32, i32) {
    %0 = arith.index_cast %arg1 : i32 to index
    %1 = memref.load %arg2[%0] : memref<1xi32, #tpu.memory_space<smem>>
    %c0_i32 = arith.constant 0 : i32
    %c0_i32_0 = arith.constant 0 : i32
    %c0_i32_1 = arith.constant 0 : i32
    return %c0_i32, %1, %arg0, %c0_i32_0 : i32, i32, i32, i32
  }
}

</mosaic_0001>

<bundles_post_ra>
// kernel: _channel_dropout_jit.1
= control target key start
LH: loop header
LB: loop body
LE: loop exit
PB: predicated region body
PF: predicated region fallthrough
CT: control target
= control target key end

     0   :  { %v61_v0 = vmov 0.0   ;;  %s83_s0 = inlined_call_operand.<no memory space> [shape: s32[1], index: 0, kind: input, shape index: {}]   ;;  %s84_s1 = inlined_call_operand.vmem [shape: f32[2,4,2,128], index: 1, kind: input, shape index: {}, may-alias: {1,2}]   ;;  %s85_s2 = inlined_call_operand.vmem [shape: f32[2,4,2,128], index: 2, kind: output, shape index: {}, may-alias: {1,2}]  }
   0x1   :  { %9 = vst [vmem:[#allocation4] sm:$0x3] %v61_v0  ;;  %10 = vst [vmem:[#allocation4 + $0x2] sm:$0x3] %v61_v0  ;;  %s59_s11 = sshll.u32 %s83_s0, 1 }
   0x2   :  { %s15_s14 = scalar_lea.vmem %s85_s2, %s59_s11 }
   0x8   :  { %v31_v1 = vld [vmem:[#allocation4] sm:$0x3]  ;;  %v33_v2 = vld [vmem:[#allocation4 + $0x2] sm:$0x3] }
   0x9   :  { %32 = vst [vmem:[%s15_s14] sm:$0x3] %v31_v1  ;;  %34 = vst [vmem:[%s15_s14 + $0x8] sm:$0x3] %v33_v2 }

</bundles_post_ra>
